<compile_context>
chip_gen: v6e
topology: v6e:2x2x1
jax: 0.10.0
libtpu: 0.0.40
codegen_flags: <defaults>
</compile_context>

<pallas_src>
import numpy as np

import jax
import jax.numpy as jnp
from jax.experimental import pallas as pl
from jax.experimental.pallas import tpu as pltpu


# ---------------------------------------------------------------------------
# fused kernel: feature matmul (amount Linear + all ticker convs folded into
# one structured bf16 weight) + ReLU, then the num_mlp Linear+ReLU head.
# Weights/biases are resident (constant block index); x/out tiled over grid.
# ---------------------------------------------------------------------------
def _make_fused_kernel(num_mlp):
    def kernel(x_ref, wf_ref, wm_ref, b_ref, o_ref):
        F_pad = wf_ref.shape[1]          # feature width (lane aligned)
        N_pad = wm_ref.shape[1]          # padded MLP width (lane aligned)

        xb = x_ref[...].astype(jnp.bfloat16)                       # (TM, CL_pad)
        h = jnp.dot(xb, wf_ref[...], preferred_element_type=jnp.float32)
        h = jnp.maximum(h + b_ref[0:1, 0:F_pad], 0.0)              # (TM, F_pad)

        off = 0
        k_dims = [F_pad] + [N_pad] * (num_mlp - 1)
        for li in range(num_mlp):                                  # unrolled
            w = wm_ref[off:off + k_dims[li], :]                    # static slice
            b = b_ref[li + 1:li + 2, 0:N_pad]
            h = jnp.maximum(
                jnp.dot(h.astype(jnp.bfloat16), w,
                        preferred_element_type=jnp.float32) + b, 0.0)
            off += k_dims[li]
        o_ref[...] = h.astype(o_ref.dtype)
    return kernel


def process_network_forward(x, params):
    W_feat = params['W_feat']                                      # (CL_pad, F_pad) bf16
    W_mlp = params['W_mlp']                                        # (F_pad+(n-1)*N_pad, N_pad) bf16
    b_all = params['b_all']                                        # (1+num_mlp, BW) f32
    num_mlp = params['num_mlp']
    out_dim = params['out_dim']

    CL_pad, F_pad = W_feat.shape
    N_pad = W_mlp.shape[1]

    B = x.shape[0]
    x_flat = x.reshape(B, -1).astype(jnp.float32)                  # (B, C_total*L)
    CL = x_flat.shape[1]

    # pad batch to a multiple of 8 sublanes; pick one tile if small
    TM = min(128, ((B + 7) // 8) * 8)
    B_pad = ((B + TM - 1) // TM) * TM
    x_pad = jnp.zeros((B_pad, CL_pad), jnp.float32).at[:B, :CL].set(x_flat)

    grid = (B_pad // TM,)
    flops = 2 * B_pad * (CL_pad * F_pad + F_pad * N_pad
                         + (num_mlp - 1) * N_pad * N_pad)
    bytes_accessed = (x_pad.size * 4 + W_feat.size * 2 + W_mlp.size * 2
                      + b_all.size * 4 + B_pad * N_pad * 4)

    out = pl.pallas_call(
        _make_fused_kernel(num_mlp),
        out_shape=jax.ShapeDtypeStruct((B_pad, N_pad), jnp.float32),
        grid_spec=pltpu.PrefetchScalarGridSpec(
            num_scalar_prefetch=0,
            grid=grid,
            in_specs=[
                pl.BlockSpec((TM, CL_pad), lambda i: (i, 0)),      # streamed per step
                pl.BlockSpec((CL_pad, F_pad), lambda i: (0, 0)),   # resident weights
                pl.BlockSpec(tuple(W_mlp.shape), lambda i: (0, 0)),
                pl.BlockSpec(tuple(b_all.shape), lambda i: (0, 0)),
            ],
            out_specs=pl.BlockSpec((TM, N_pad), lambda i: (i, 0)),
        ),
        compiler_params=pltpu.CompilerParams(
            dimension_semantics=("parallel",)),
        cost_estimate=pl.CostEstimate(flops=flops, transcendentals=0,
                                      bytes_accessed=bytes_accessed),
    )(x_pad, W_feat, W_mlp, b_all)

    return out[:B, :out_dim]                 # drop padded rows / padded lanes


# ---------------------------------------------------------------------------
# deterministic parameter init (matches torch: xavier_uniform_ weights, zero
# biases) + host-side folding/padding.  Weights are bf16-rounded once so the
# kernel (bf16 storage) and the pure-JAX reference share identical values.
# ---------------------------------------------------------------------------
def _xavier_uniform(key, shape, fan_in, fan_out):
    bound = (6.0 / (fan_in + fan_out)) ** 0.5
    return jax.random.uniform(key, shape, jnp.float32, -bound, bound)


def _bf16_round(w):
    return jnp.asarray(w, jnp.float32).astype(jnp.bfloat16).astype(jnp.float32)


def init_params(key, state_dims, mlp_list, n_conv, K, n_fc):
    d0, d1, d2, L = state_dims
    Lout = L - K + 1
    C_total = d0 + d1 * d2
    num_fc_in = n_fc + d1 * n_conv * Lout
    CL = C_total * L
    num_mlp = len(mlp_list)

    rup = lambda v, m: ((v + m - 1) // m) * m
    CL_pad = rup(CL, 128)                   # lane-align the contraction axis
    F_pad = rup(num_fc_in, 128)             # lane-align the feature width
    N_pad = rup(max(mlp_list), 128)         # lane-align all MLP widths

    keys = jax.random.split(key, d1 + 1 + num_mlp)

    # Conv1d weights, torch layout (out_channels, in_channels, kernel)
    conv_w = jnp.stack([
        _xavier_uniform(keys[i], (n_conv, d2, K), fan_in=d2 * K, fan_out=n_conv * K)
        for i in range(d1)])                                       # (d1, n_conv, d2, K)
    conv_b = jnp.zeros((d1, n_conv), jnp.float32)

    amt_w = _xavier_uniform(keys[d1], (n_fc, d0), fan_in=d0, fan_out=n_fc)
    amt_b = jnp.zeros((n_fc,), jnp.float32)

    dims = [num_fc_in] + list(mlp_list)
    ws = [_xavier_uniform(keys[d1 + 1 + j], (dims[j + 1], dims[j]),
                          fan_in=dims[j], fan_out=dims[j + 1]) for j in range(num_mlp)]
    bs = [jnp.zeros((dims[j + 1],), jnp.float32) for j in range(num_mlp)]

    # bf16-round once (storage dtype of the kernel weights)
    conv_w = _bf16_round(conv_w)
    amt_w = _bf16_round(amt_w)
    ws = [_bf16_round(w) for w in ws]

    conv_w_np = np.asarray(conv_w)
    amt_w_np = np.asarray(amt_w)

    # ---- fold amount Linear + per-ticker convs into one structured matrix ----
    # feature column layout matches torch: [amount(n_fc)] + per ticker i the
    # flatten(start_dim=1) of the conv output: column n_fc + i*n_conv*Lout
    # + c*Lout + t  <-  sum_{ch,k} w_i[c,ch,k] * x[b, d0+i*d2+ch, t+k]
    W_feat = np.zeros((CL_pad, F_pad), np.float32)
    b_feat = np.zeros((F_pad,), np.float32)

    for ch in range(d0):                                           # amount Linear block
        W_feat[ch * L + (L - 1), 0:n_fc] = amt_w_np[:, ch]
    b_feat[0:n_fc] = np.asarray(amt_b)

    c_idx = np.arange(n_conv)
    for i in range(d1):                                            # ticker conv blocks
        base = n_fc + i * n_conv * Lout
        for ch in range(d2):
            row0 = (d0 + i * d2 + ch) * L
            for k in range(K):
                for t in range(Lout):
                    W_feat[row0 + t + k, base + c_idx * Lout + t] = conv_w_np[i, :, ch, k]
        b_feat[base:base + n_conv * Lout] = np.repeat(np.asarray(conv_b[i]), Lout)

    # ---- padded / transposed MLP weights, concatenated along the K axis ----
    k_dims = [F_pad] + [N_pad] * (num_mlp - 1)
    k_real = [num_fc_in] + list(mlp_list[:-1])
    blocks = []
    for j in range(num_mlp):
        blk = np.zeros((k_dims[j], N_pad), np.float32)
        blk[:k_real[j], :mlp_list[j]] = np.asarray(ws[j]).T
        blocks.append(blk)
    W_mlp = np.concatenate(blocks, axis=0)                         # (F_pad+(n-1)*N_pad, N_pad)

    # ---- all biases in a single small operand ----
    BW = max(F_pad, N_pad)
    b_all = np.zeros((1 + num_mlp, BW), np.float32)
    b_all[0, :F_pad] = b_feat
    for j in range(num_mlp):
        b_all[1 + j, :mlp_list[j]] = np.asarray(bs[j])

    return {
        # kernel operands (folded / transposed / padded / bf16 weights)
        'W_feat': jnp.asarray(W_feat).astype(jnp.bfloat16),
        'W_mlp': jnp.asarray(W_mlp).astype(jnp.bfloat16),
        'b_all': jnp.asarray(b_all, jnp.float32),
        'num_mlp': num_mlp,
        'out_dim': mlp_list[-1],
        # f32 torch-layout copies (same bf16-rounded values) for the reference
        'conv_w_torch': conv_w, 'conv_b': conv_b,
        'amt_w_torch': amt_w, 'amt_b': amt_b,
        'w_torch': ws, 'b_torch': bs,
    }


# ---------------------------------------------------------------------------
# pure-JAX reference of the torch forward (correctness check only)
# ---------------------------------------------------------------------------
def reference_forward(x, params, *, state_dims, K):
    d0, d1, d2, L = state_dims
    B = x.shape[0]
    feats = [jnp.maximum(x[:, :d0, -1] @ params['amt_w_torch'].T
                         + params['amt_b'][None, :], 0.0)]
    for i in range(d1):
        xi = x[:, d0 + i * d2: d0 + (i + 1) * d2, :]
        y = jax.lax.conv_general_dilated(
            xi, params['conv_w_torch'][i], window_strides=(1,), padding='VALID',
            dimension_numbers=('NCH', 'OIH', 'NCH'))
        y = jnp.maximum(y + params['conv_b'][i][None, :, None], 0.0)
        feats.append(y.reshape(B, -1))
    h = jnp.concatenate(feats, axis=1)
    for w, b in zip(params['w_torch'], params['b_torch']):
        h = jnp.maximum(h @ w.T + b[None, :], 0.0)
    return h


if __name__ == "__main__":
    # state_dims = (amount dims d0, num tickers d1, channels/ticker d2, seq len L)
    state_dims = (4, 2, 3, 16)
    mlp_list = [64, 32, 16]
    n_conv, conv_kernel, n_fc = 16, 4, 16
    B = 2

    key = jax.random.PRNGKey(0)
    kp, kx = jax.random.split(key)
    params = init_params(kp, state_dims, mlp_list, n_conv, conv_kernel, n_fc)

    C_total = state_dims[0] + state_dims[1] * state_dims[2]        # = 10
    x = jax.random.normal(kx, (B, C_total, state_dims[3]), jnp.float32)

    out = process_network_forward(x, params)
    out = jax.block_until_ready(out)

    ref = reference_forward(x, params, state_dims=state_dims, K=conv_kernel)
    assert out.shape == (B, mlp_list[-1]), out.shape
    # bf16 MXU activations vs f32 reference (same bf16-rounded weights): looser tol
    assert jnp.allclose(out, ref, rtol=2e-2, atol=2e-2), \
        float(jnp.max(jnp.abs(out - ref)))
    print("KERNEL_OK")
</pallas_src>

<mosaic_0001>
module attributes {stable_mosaic.version = 11 : i64} {
  func.func @kernel(%arg0: i32, %arg1: memref<8x256xf32, #tpu.memory_space<vmem>>, %arg2: memref<256x512xbf16, #tpu.memory_space<vmem>>, %arg3: memref<768x128xbf16, #tpu.memory_space<vmem>>, %arg4: memref<4x512xf32, #tpu.memory_space<vmem>>, %arg5: memref<8x128xf32, #tpu.memory_space<vmem>>) attributes {dimension_semantics = [#tpu.dimension_semantics<parallel>], iteration_bounds = array<i64: 1>, scalar_prefetch = 0 : i64, scratch_operands = 0 : i64, tpu.core_type = #tpu.core_type<tc>, window_params = [{transform_indices = @transform_0, window_bounds = array<i64: 8, 256>}, {pipeline_mode = #tpu.pipeline_mode<synchronous>, transform_indices = @transform_1, window_bounds = array<i64: 256, 512>}, {pipeline_mode = #tpu.pipeline_mode<synchronous>, transform_indices = @transform_2, window_bounds = array<i64: 768, 128>}, {pipeline_mode = #tpu.pipeline_mode<synchronous>, transform_indices = @transform_3, window_bounds = array<i64: 4, 512>}, {transform_indices = @transform_4, window_bounds = array<i64: 8, 128>}]} {
    %c0 = arith.constant 0 : index
    %c0_0 = arith.constant 0 : index
    %0 = vector.load %arg1[%c0, %c0_0] : memref<8x256xf32, #tpu.memory_space<vmem>>, vector<8x256xf32>
    %1 = arith.truncf %0 : vector<8x256xf32> to vector<8x256xbf16>
    %c0_1 = arith.constant 0 : index
    %c0_2 = arith.constant 0 : index
    %2 = vector.load %arg2[%c0_1, %c0_2] : memref<256x512xbf16, #tpu.memory_space<vmem>>, vector<256x512xbf16>
    %cst = arith.constant dense<0.000000e+00> : vector<8x512xf32>
    %3 = tpu.matmul %1, %2, %cst {dimension_numbers = #tpu.dot_dimension_numbers<[1], [0], [0], [1], [0, 0, 1, 1], [], []>} : vector<8x256xbf16>, vector<256x512xbf16>, vector<8x512xf32> -> vector<8x512xf32>
    %c0_3 = arith.constant 0 : index
    %c0_4 = arith.constant 0 : index
    %4 = vector.load %arg4[%c0_3, %c0_4] : memref<4x512xf32, #tpu.memory_space<vmem>>, vector<1x512xf32>
    %5 = vector.broadcast %4 : vector<1x512xf32> to vector<8x512xf32>
    %6 = arith.addf %3, %5 : vector<8x512xf32>
    %cst_5 = arith.constant 0.000000e+00 : f32
    %7 = vector.broadcast %cst_5 : f32 to vector<8x512xf32>
    %8 = arith.maximumf %6, %7 : vector<8x512xf32>
    %c0_6 = arith.constant 0 : index
    %c0_7 = arith.constant 0 : index
    %9 = vector.load %arg3[%c0_6, %c0_7] : memref<768x128xbf16, #tpu.memory_space<vmem>>, vector<512x128xbf16>
    %c1 = arith.constant 1 : index
    %c0_8 = arith.constant 0 : index
    %10 = vector.load %arg4[%c1, %c0_8] : memref<4x512xf32, #tpu.memory_space<vmem>>, vector<1x128xf32>
    %11 = arith.truncf %8 : vector<8x512xf32> to vector<8x512xbf16>
    %cst_9 = arith.constant dense<0.000000e+00> : vector<8x128xf32>
    %12 = tpu.matmul %11, %9, %cst_9 {dimension_numbers = #tpu.dot_dimension_numbers<[1], [0], [0], [1], [0, 0, 1, 1], [], []>} : vector<8x512xbf16>, vector<512x128xbf16>, vector<8x128xf32> -> vector<8x128xf32>
    %13 = vector.broadcast %10 : vector<1x128xf32> to vector<8x128xf32>
    %14 = arith.addf %12, %13 : vector<8x128xf32>
    %cst_10 = arith.constant 0.000000e+00 : f32
    %15 = vector.broadcast %cst_10 : f32 to vector<8x128xf32>
    %16 = arith.maximumf %14, %15 : vector<8x128xf32>
    %c512 = arith.constant 512 : index
    %c0_11 = arith.constant 0 : index
    %17 = vector.load %arg3[%c512, %c0_11] : memref<768x128xbf16, #tpu.memory_space<vmem>>, vector<128x128xbf16>
    %c2 = arith.constant 2 : index
    %c0_12 = arith.constant 0 : index
    %18 = vector.load %arg4[%c2, %c0_12] : memref<4x512xf32, #tpu.memory_space<vmem>>, vector<1x128xf32>
    %19 = arith.truncf %16 : vector<8x128xf32> to vector<8x128xbf16>
    %cst_13 = arith.constant dense<0.000000e+00> : vector<8x128xf32>
    %20 = tpu.matmul %19, %17, %cst_13 {dimension_numbers = #tpu.dot_dimension_numbers<[1], [0], [0], [1], [0, 0, 1, 1], [], []>} : vector<8x128xbf16>, vector<128x128xbf16>, vector<8x128xf32> -> vector<8x128xf32>
    %21 = vector.broadcast %18 : vector<1x128xf32> to vector<8x128xf32>
    %22 = arith.addf %20, %21 : vector<8x128xf32>
    %cst_14 = arith.constant 0.000000e+00 : f32
    %23 = vector.broadcast %cst_14 : f32 to vector<8x128xf32>
    %24 = arith.maximumf %22, %23 : vector<8x128xf32>
    %c640 = arith.constant 640 : index
    %c0_15 = arith.constant 0 : index
    %25 = vector.load %arg3[%c640, %c0_15] : memref<768x128xbf16, #tpu.memory_space<vmem>>, vector<128x128xbf16>
    %c3 = arith.constant 3 : index
    %c0_16 = arith.constant 0 : index
    %26 = vector.load %arg4[%c3, %c0_16] : memref<4x512xf32, #tpu.memory_space<vmem>>, vector<1x128xf32>
    %27 = arith.truncf %24 : vector<8x128xf32> to vector<8x128xbf16>
    %cst_17 = arith.constant dense<0.000000e+00> : vector<8x128xf32>
    %28 = tpu.matmul %27, %25, %cst_17 {dimension_numbers = #tpu.dot_dimension_numbers<[1], [0], [0], [1], [0, 0, 1, 1], [], []>} : vector<8x128xbf16>, vector<128x128xbf16>, vector<8x128xf32> -> vector<8x128xf32>
    %29 = vector.broadcast %26 : vector<1x128xf32> to vector<8x128xf32>
    %30 = arith.addf %28, %29 : vector<8x128xf32>
    %cst_18 = arith.constant 0.000000e+00 : f32
    %31 = vector.broadcast %cst_18 : f32 to vector<8x128xf32>
    %32 = arith.maximumf %30, %31 : vector<8x128xf32>
    %c0_19 = arith.constant 0 : index
    %c0_20 = arith.constant 0 : index
    %33 = vector.load %arg5[%c0_19, %c0_20] : memref<8x128xf32, #tpu.memory_space<vmem>>, vector<8x128xf32>
    tpu.vector_store %arg5[%c0_19, %c0_20], %32 {strides = array<i32>} : memref<8x128xf32, #tpu.memory_space<vmem>>, vector<8x128xf32>,
    return
  }
  func.func @transform_0(%arg0: i32) -> (i32, i32) {
    %c0_i32 = arith.constant 0 : i32
    %c0_i32_0 = arith.constant 0 : i32
    return %arg0, %c0_i32 : i32, i32
  }
  func.func @transform_1(%arg0: i32) -> (i32, i32) {
    %c0_i32 = arith.constant 0 : i32
    %c0_i32_0 = arith.constant 0 : i32
    %c0_i32_1 = arith.constant 0 : i32
    return %c0_i32, %c0_i32_0 : i32, i32
  }
  func.func @transform_2(%arg0: i32) -> (i32, i32) {
    %c0_i32 = arith.constant 0 : i32
    %c0_i32_0 = arith.constant 0 : i32
    %c0_i32_1 = arith.constant 0 : i32
    return %c0_i32, %c0_i32_0 : i32, i32
  }
  func.func @transform_3(%arg0: i32) -> (i32, i32) {
    %c0_i32 = arith.constant 0 : i32
    %c0_i32_0 = arith.constant 0 : i32
    %c0_i32_1 = arith.constant 0 : i32
    return %c0_i32, %c0_i32_0 : i32, i32
  }
  func.func @transform_4(%arg0: i32) -> (i32, i32) {
    %c0_i32 = arith.constant 0 : i32
    %c0_i32_0 = arith.constant 0 : i32
    return %arg0, %c0_i32 : i32, i32
  }
}

</mosaic_0001>

<bundles_post_ra>
// kernel: tpu_custom_call.1
= control target key start
LH: loop header
LB: loop body
LE: loop exit
PB: predicated region body
PF: predicated region fallthrough
CT: control target
= control target key end

     0   :  { %9 = vsyncpa [#allocation3], 0  ;;  %s1701_s0 = inlined_call_operand.hbm [shape: f32[8,256], index: 0, kind: input, shape index: {}]   ;;  %s1702_s1 = inlined_call_operand.hbm [shape: bf16[256,512], index: 1, kind: input, shape index: {}]   ;;  %s1703_s2 = inlined_call_operand.hbm [shape: bf16[768,128], index: 2, kind: input, shape index: {}]   ;;  %s1704_s3 = inlined_call_operand.hbm [shape: f32[4,512], index: 3, kind: input, shape index: {}]   ;;  %s1705_s4 = inlined_call_operand.hbm [shape: f32[8,128], index: 4, kind: output, shape index: {}]  }
   0x1   :  { %10 = vsyncpa [#allocation6], 0 }
   0x2   :  { %11 = vsyncpa [#allocation9], 0 }
   0x3   :  { %12 = vsyncpa [#allocation4], 0  ;;  %s1632_s15 = smov [#allocation5]  }
   0x4   :  { %s28_s16 = sshll.u32 %s1632_s15, 4  ;;  %s29_s16 = int_to_ptr.vmem [resolvable:$true] %s28_s16 }
   0x5   :  { %s1532_s17 = scalar_lea.vmem %s29_s16, 8192  ;;  %p1537_p1 = scmp.lt.s32.totalorder %s29_s16, %s29_s16 }
   0x6   :  { %p1533_p0 = scmp.ne.s32.totalorder %s29_s16, %s1532_s17  ;;  %p1538_p2 = scmp.lt.s32.totalorder %s1532_s17, %s1532_s17 }
   0x8   :  { %p1539_p3 = por %p1538_p2, %p1537_p1 }
   0xa   :  { %p1540_p4 = pnand %p1539_p3, %p1533_p0 }
   0xc   :  { %1543 = shalt.err (!%p1540_p4)
}
   0xd   :  { %s1633_s18 = smov 256   ;;  %s1634_s19 = smov 16  }
   0xe   :  { %34 = dma.hbm_to_vmem [thread:$0]  %s1702_s1, 8192, %s29_s16, [#allocation6], %s1633_s18, %s1633_s18, %s1634_s19  }
   0xf   :  { %s1635_s22 = smov [#allocation2]   ;;  %s1636_s24 = smov [#allocation7]  }
  0x10   :  { %s19_s23 = sshll.u32 %s1635_s22, 4  ;;  %s40_s25 = sshll.u32 %s1636_s24, 4  ;;  %s20_s23 = int_to_ptr.vmem [resolvable:$true] %s19_s23  ;;  %s41_s25 = int_to_ptr.vmem [resolvable:$true] %s40_s25 }
  0x11   :  { %s1552_s26 = scalar_lea.vmem %s20_s23, 256  ;;  %p1557_p6 = scmp.lt.s32.totalorder %s20_s23, %s20_s23 }
  0x12   :  { %p1553_p5 = scmp.ne.s32.totalorder %s20_s23, %s1552_s26  ;;  %p1558_p7 = scmp.lt.s32.totalorder %s1552_s26, %s1552_s26 }
  0x14   :  { %p1559_p8 = por %p1558_p7, %p1557_p6 }
  0x16   :  { %p1560_p9 = pnand %p1559_p8, %p1553_p5 }
  0x18   :  { %1563 = shalt.err (!%p1560_p9)
}
  0x19   :  { %22 = dma.hbm_to_vmem [thread:$0]  %s1701_s0, 256, %s20_s23, [#allocation3]  }
  0x1a   :  { %s1572_s29 = scalar_lea.vmem %s41_s25, 6144  ;;  %p1577_p11 = scmp.lt.s32.totalorder %s41_s25, %s41_s25 }
  0x1b   :  { %p1573_p10 = scmp.ne.s32.totalorder %s41_s25, %s1572_s29  ;;  %p1578_p12 = scmp.lt.s32.totalorder %s1572_s29, %s1572_s29 }
  0x1d   :  { %p1579_p13 = por %p1578_p12, %p1577_p11 }
  0x1f   :  { %p1580_p0 = pnand %p1579_p13, %p1573_p10 }
  0x21   :  { %1583 = shalt.err (!%p1580_p0)
}
  0x22   :  { %s1637_s1 = smov 64   ;;  %s1638_s30 = smov 4  }
  0x23   :  { %46 = dma.hbm_to_vmem [thread:$0]  %s1703_s2, 6144, %s41_s25, [#allocation6], %s1637_s1, %s1637_s1, %s1638_s30  }
  0x24   :  { %s1639_s7 = smov [#allocation8]  }
  0x25   :  { %s53_s8 = sshll.u32 %s1639_s7, 4  ;;  %s54_s8 = int_to_ptr.vmem [resolvable:$true] %s53_s8 }
  0x26   :  { %s1592_s9 = scalar_lea.vmem %s54_s8, 256  ;;  %p1597_p2 = scmp.lt.s32.totalorder %s54_s8, %s54_s8 }
  0x27   :  { %p1593_p1 = scmp.ne.s32.totalorder %s54_s8, %s1592_s9  ;;  %p1598_p3 = scmp.lt.s32.totalorder %s1592_s9, %s1592_s9 }
  0x29   :  { %p1599_p4 = por %p1598_p3, %p1597_p2 }
  0x2b   :  { %p1600_p5 = pnand %p1599_p4, %p1593_p1 }
  0x2d   :  { %1603 = shalt.err (!%p1600_p5)
}
  0x2e   :  { %56 = dma.hbm_to_vmem [thread:$0]  %s1704_s3, 256, %s54_s8, [#allocation9]  }
  0x2f   :  { %1624 = dma.done.wait [#allocation3], 256  }
  0x30   :  { %1625 = vsyncadd [#allocation3], 4294967040 }
  0x31   :  { %1626 = dma.done.wait [#allocation6], 14336  }
  0x32   :  { %1627 = vsyncadd [#allocation6], 4294952960 }
  0x33   :  { %1628 = dma.done.wait [#allocation9], 256  }
  0x34   :  { %1629 = vsyncadd [#allocation9], 4294967040  ;;  %v1380_v0 = vld [vmem:[#allocation5 + $0xe4] ss:$16 sps:$4 sm:$0xff]   ;;  %v1382_v1 = vld [vmem:[#allocation5 + $0xec] ss:$16 sps:$4 sm:$0xff]  }
  0x35   :  { %480 = vmatprep.subr.bf16.mxu0 %v1380_v0  ;;  %v1384_v2 = vld [vmem:[#allocation5 + $0xe0] ss:$16 sps:$4 sm:$0xff]   ;;  %v1385_v3 = vld [vmem:[#allocation5 + $0xe8] ss:$16 sps:$4 sm:$0xff]   ;;  %521 = vmatprep.subr.bf16.mxu1 %v1382_v1  ;;  %v1386_v4 = vld [vmem:[#allocation5 + $0xc4] ss:$16 sps:$4 sm:$0xff]  }
  0x36   :  { %481 = vmatpush1.bf16.msra.mxu0 %v1384_v2  ;;  %522 = vmatpush1.bf16.msra.mxu1 %v1385_v3  ;;  %v1388_v5 = vld [vmem:[#allocation5 + $0xcc] ss:$16 sps:$4 sm:$0xff]   ;;  %v1390_v6 = vld [vmem:[#allocation5 + $0xc0] ss:$16 sps:$4 sm:$0xff]   ;;  %v1391_v7 = vld [vmem:[#allocation5 + $0xc8] ss:$16 sps:$4 sm:$0xff]  }
  0x37   :  { %482 = vmatprep.subr.bf16.mxu0 %v1386_v4  ;;  %523 = vmatprep.subr.bf16.mxu1 %v1388_v5  ;;  %v1392_v8 = vld [vmem:[#allocation5 + $0xa4] ss:$16 sps:$4 sm:$0xff]   ;;  %v1394_v9 = vld [vmem:[#allocation5 + $0xac] ss:$16 sps:$4 sm:$0xff]   ;;  %v1396_v10 = vld [vmem:[#allocation5 + $0xa0] ss:$16 sps:$4 sm:$0xff]  }
  0x38   :  { %v1397_v11 = vld [vmem:[#allocation5 + $0xa8] ss:$16 sps:$4 sm:$0xff]   ;;  %v1398_v12 = vld [vmem:[#allocation5 + $0x84] ss:$16 sps:$4 sm:$0xff]   ;;  %v1400_v13 = vld [vmem:[#allocation5 + $0x8c] ss:$16 sps:$4 sm:$0xff]  }
  0x39   :  { %v1402_v14 = vld [vmem:[#allocation5 + $0x80] ss:$16 sps:$4 sm:$0xff]   ;;  %v1403_v15 = vld [vmem:[#allocation5 + $0x88] ss:$16 sps:$4 sm:$0xff]   ;;  %v1404_v16 = vld [vmem:[#allocation5 + $0x64] ss:$16 sps:$4 sm:$0xff]  }
  0x3a   :  { %483 = vmatpush1.bf16.msra.mxu0 %v1390_v6  ;;  %524 = vmatpush1.bf16.msra.mxu1 %v1391_v7  ;;  %v1406_v17 = vld [vmem:[#allocation5 + $0x6c] ss:$16 sps:$4 sm:$0xff]   ;;  %v1408_v18 = vld [vmem:[#allocation5 + $0x60] ss:$16 sps:$4 sm:$0xff]   ;;  %v1409_v19 = vld [vmem:[#allocation5 + $0x68] ss:$16 sps:$4 sm:$0xff]  }
  0x3b   :  { %484 = vmatprep.subr.bf16.mxu0 %v1392_v8  ;;  %525 = vmatprep.subr.bf16.mxu1 %v1394_v9  ;;  %v1410_v20 = vld [vmem:[#allocation5 + $0x44] ss:$16 sps:$4 sm:$0xff]   ;;  %v1412_v21 = vld [vmem:[#allocation5 + $0x4c] ss:$16 sps:$4 sm:$0xff]   ;;  %v1414_v22 = vld [vmem:[#allocation5 + $0x40] ss:$16 sps:$4 sm:$0xff]  }
  0x3c   :  { %v1415_v23 = vld [vmem:[#allocation5 + $0x48] ss:$16 sps:$4 sm:$0xff]   ;;  %v1416_v24 = vld [vmem:[#allocation5 + $0x24] ss:$16 sps:$4 sm:$0xff]   ;;  %v1418_v25 = vld [vmem:[#allocation5 + $0x2c] ss:$16 sps:$4 sm:$0xff]  }
  0x3d   :  { %v1420_v26 = vld [vmem:[#allocation5 + $0x20] ss:$16 sps:$4 sm:$0xff]   ;;  %v1421_v27 = vld [vmem:[#allocation5 + $0x28] ss:$16 sps:$4 sm:$0xff]   ;;  %v1422_v28 = vld [vmem:[#allocation5 + $0x4] ss:$16 sps:$4 sm:$0xff]  }
  0x3e   :  { %485 = vmatpush1.bf16.msra.mxu0 %v1396_v10  ;;  %526 = vmatpush1.bf16.msra.mxu1 %v1397_v11  ;;  %v1424_v29 = vld [vmem:[#allocation5 + $0xc] ss:$16 sps:$4 sm:$0xff]   ;;  %v1426_v30 = vld [vmem:[#allocation5] ss:$16 sps:$4 sm:$0xff]   ;;  %v1427_v31 = vld [vmem:[#allocation5 + $0x8] ss:$16 sps:$4 sm:$0xff]  }
  0x3f   :  { %486 = vmatprep.subr.bf16.mxu0 %v1398_v12  ;;  %527 = vmatprep.subr.bf16.mxu1 %v1400_v13  ;;  %v1428_v32 = vld [vmem:[#allocation5 + $0x1e4] ss:$16 sps:$4 sm:$0xff]   ;;  %v1430_v33 = vld [vmem:[#allocation5 + $0x1ec] ss:$16 sps:$4 sm:$0xff]   ;;  %v1432_v34 = vld [vmem:[#allocation5 + $0x1e0] ss:$16 sps:$4 sm:$0xff]  }
  0x40   :  { %v1433_v35 = vld [vmem:[#allocation5 + $0x1e8] ss:$16 sps:$4 sm:$0xff]   ;;  %v1434_v36 = vld [vmem:[#allocation5 + $0x1c4] ss:$16 sps:$4 sm:$0xff]   ;;  %v1436_v37 = vld [vmem:[#allocation5 + $0x1cc] ss:$16 sps:$4 sm:$0xff]  }
  0x41   :  { %v1438_v38 = vld [vmem:[#allocation5 + $0x1c0] ss:$16 sps:$4 sm:$0xff]   ;;  %v1439_v39 = vld [vmem:[#allocation5 + $0x1c8] ss:$16 sps:$4 sm:$0xff]   ;;  %v1440_v40 = vld [vmem:[#allocation5 + $0x1a4] ss:$16 sps:$4 sm:$0xff]  }
  0x42   :  { %487 = vmatpush1.bf16.msra.mxu0 %v1402_v14  ;;  %528 = vmatpush1.bf16.msra.mxu1 %v1403_v15  ;;  %v1442_v41 = vld [vmem:[#allocation5 + $0x1ac] ss:$16 sps:$4 sm:$0xff]   ;;  %v1444_v42 = vld [vmem:[#allocation5 + $0x1a0] ss:$16 sps:$4 sm:$0xff]   ;;  %v1445_v43 = vld [vmem:[#allocation5 + $0x1a8] ss:$16 sps:$4 sm:$0xff]  }
  0x43   :  { %488 = vmatprep.subr.bf16.mxu0 %v1404_v16  ;;  %529 = vmatprep.subr.bf16.mxu1 %v1406_v17  ;;  %v1446_v44 = vld [vmem:[#allocation5 + $0x184] ss:$16 sps:$4 sm:$0xff]   ;;  %v1448_v45 = vld [vmem:[#allocation5 + $0x18c] ss:$16 sps:$4 sm:$0xff]   ;;  %v1450_v46 = vld [vmem:[#allocation5 + $0x180] ss:$16 sps:$4 sm:$0xff]  }
  0x44   :  { %v71_v47 = vld [vmem:[#allocation2 + $0x8] sm:$0xff]  ;;  %v1452_v50 = vld [vmem:[#allocation5 + $0x164] ss:$16 sps:$4 sm:$0xff]   ;;  %v1456_v52 = vld [vmem:[#allocation5 + $0x160] ss:$16 sps:$4 sm:$0xff]   ;;  %vm1641_vm0 = vmmov 0  }
  0x45   :  { %v1451_v48 = vld [vmem:[#allocation5 + $0x188] ss:$16 sps:$4 sm:$0xff]   ;;  %v73_v49 = vpack.c.bf16 %v71_v47, %v71_v47  ;;  %v1454_v51 = vld [vmem:[#allocation5 + $0x16c] ss:$16 sps:$4 sm:$0xff]   ;;  %v1458_v54 = vld [vmem:[#allocation5 + $0x144] ss:$16 sps:$4 sm:$0xff]  }
  0x46   :  { %489 = vmatpush1.bf16.msra.mxu0 %v1408_v18  ;;  %530 = vmatpush1.bf16.msra.mxu1 %v1409_v19  ;;  %v1457_v53 = vld [vmem:[#allocation5 + $0x168] ss:$16 sps:$4 sm:$0xff]   ;;  %v1460_v55 = vld [vmem:[#allocation5 + $0x14c] ss:$16 sps:$4 sm:$0xff]   ;;  %v1462_v56 = vld [vmem:[#allocation5 + $0x140] ss:$16 sps:$4 sm:$0xff]  }
  0x47   :  { %490 = vmatprep.subr.bf16.mxu0 %v1410_v20  ;;  %531 = vmatprep.subr.bf16.mxu1 %v1412_v21  ;;  %v1463_v57 = vld [vmem:[#allocation5 + $0x148] ss:$16 sps:$4 sm:$0xff]   ;;  %v1464_v58 = vld [vmem:[#allocation5 + $0x124] ss:$16 sps:$4 sm:$0xff]   ;;  %v1466_v59 = vld [vmem:[#allocation5 + $0x12c] ss:$16 sps:$4 sm:$0xff]  }
  0x48   :  { %512 = vmatprep.mubr.bf16.mxu0 %v73_v49  ;;  %553 = vmatprep.mubr.bf16.mxu1 %v73_v49  ;;  %v1468_v60 = vld [vmem:[#allocation5 + $0x120] ss:$16 sps:$4 sm:$0xff]   ;;  %v1469_v61 = vld [vmem:[#allocation5 + $0x128] ss:$16 sps:$4 sm:$0xff]   ;;  %v1470_v62 = vld [vmem:[#allocation5 + $0x104] ss:$16 sps:$4 sm:$0xff]  }
  0x49   :  { %v1472_v63 = vld [vmem:[#allocation5 + $0x10c] ss:$16 sps:$4 sm:$0xff]   ;;  %v1474_v0 = vld [vmem:[#allocation5 + $0x100] ss:$16 sps:$4 sm:$0xff]   ;;  %v1475_v1 = vld [vmem:[#allocation5 + $0x108] ss:$16 sps:$4 sm:$0xff]  }
  0x4a   :  { %491 = vmatpush1.bf16.msra.mxu0 %v1414_v22  ;;  %532 = vmatpush1.bf16.msra.mxu1 %v1415_v23  ;;  %v70_v2 = vld [vmem:[#allocation2] sm:$0xff]  ;;  %v1476_v3 = vld [vmem:[#allocation7 + $0x78] sm:$0xff]   ;;  %v1484_v12 = vld [vmem:[#allocation7 + $0x68] sm:$0xff]   ;;  %s1642_s2 = smov [#allocation10]  }
  0x4b   :  { %492 = vmatprep.subr.bf16.mxu0 %v1416_v24  ;;  %533 = vmatprep.subr.bf16.mxu1 %v1418_v25  ;;  %v1477_v4 = vld [vmem:[#allocation7 + $0xf8] sm:$0xff]   ;;  %v72_v6 = vpack.c.bf16 %v70_v2, %v70_v2  ;;  %v1480_v8 = vld [vmem:[#allocation7 + $0x70] sm:$0xff]   ;;  %v1485_v13 = vld [vmem:[#allocation7 + $0xe8] sm:$0xff]   ;;  %s1141_s3 = sshll.u32 %s1642_s2, 4  ;;  %s1142_s3 = int_to_ptr.vmem [resolvable:$true] %s1141_s3 }
  0x4c   :  { %v1478_v5 = vld [vmem:[#allocation7 + $0x38] sm:$0xff]   ;;  %v1481_v9 = vld [vmem:[#allocation7 + $0xf0] sm:$0xff]   ;;  %v1486_v14 = vld [vmem:[#allocation7 + $0x28] sm:$0xff]   ;;  %s1604_s11 = scalar_lea.vmem %s1142_s3, 128  ;;  %p1609_p7 = scmp.lt.s32.totalorder %s1142_s3, %s1142_s3 }
  0x4d   :  { %v1479_v7 = vld [vmem:[#allocation7 + $0xb8] sm:$0xff]   ;;  %v1482_v10 = vld [vmem:[#allocation7 + $0x30] sm:$0xff]   ;;  %v1487_v15 = vld [vmem:[#allocation7 + $0xa8] sm:$0xff]   ;;  %p1605_p6 = scmp.ne.s32.totalorder %s1142_s3, %s1604_s11  ;;  %p1610_p8 = scmp.lt.s32.totalorder %s1604_s11, %s1604_s11 }
  0x4e   :  { %493 = vmatpush1.bf16.msra.mxu0 %v1420_v26  ;;  %534 = vmatpush1.bf16.msra.mxu1 %v1421_v27  ;;  %v1483_v11 = vld [vmem:[#allocation7 + $0xb0] sm:$0xff]   ;;  %v1488_v16 = vld [vmem:[#allocation7 + $0x60] sm:$0xff]   ;;  %v1492_v20 = vld [vmem:[#allocation7 + $0x58] sm:$0xff]  }
  0x4f   :  { %494 = vmatprep.subr.bf16.mxu0 %v1422_v28  ;;  %535 = vmatprep.subr.bf16.mxu1 %v1424_v29  ;;  %v1489_v17 = vld [vmem:[#allocation7 + $0xe0] sm:$0xff]   ;;  %v1493_v21 = vld [vmem:[#allocation7 + $0xd8] sm:$0xff]   ;;  %v1496_v24 = vld [vmem:[#allocation7 + $0x50] sm:$0xff]   ;;  %p1611_p9 = por %p1610_p8, %p1609_p7 }
  0x50   :  { %v1490_v18 = vld [vmem:[#allocation7 + $0x20] sm:$0xff]   ;;  %v1494_v22 = vld [vmem:[#allocation7 + $0x18] sm:$0xff]   ;;  %v1497_v25 = vld [vmem:[#allocation7 + $0xd0] sm:$0xff]  }
  0x51   :  { %v1491_v19 = vld [vmem:[#allocation7 + $0xa0] sm:$0xff]   ;;  %v1495_v23 = vld [vmem:[#allocation7 + $0x98] sm:$0xff]   ;;  %v1498_v26 = vld [vmem:[#allocation7 + $0x10] sm:$0xff]   ;;  %p1612_p10 = pnand %p1611_p9, %p1605_p6 }
  0x52   :  { %495 = vmatpush1.bf16.msra.mxu0 %v1426_v30  ;;  %536 = vmatpush1.bf16.msra.mxu1 %v1427_v31  ;;  %v1499_v27 = vld [vmem:[#allocation7 + $0x90] sm:$0xff]   ;;  %v1500_v28 = vld [vmem:[#allocation7 + $0x48] sm:$0xff]  }
  0x53   :  { %496 = vmatprep.subr.bf16.mxu0 %v1428_v32  ;;  %537 = vmatprep.subr.bf16.mxu1 %v1430_v33  ;;  %v1501_v29 = vld [vmem:[#allocation7 + $0xc8] sm:$0xff]   ;;  %v1504_v32 = vld [vmem:[#allocation7 + $0x40] sm:$0xff]  }
  0x54   :  { %v1502_v30 = vld [vmem:[#allocation7 + $0x8] sm:$0xff]   ;;  %v1505_v33 = vld [vmem:[#allocation7 + $0xc0] sm:$0xff]  }
  0x55   :  { %v1503_v31 = vld [vmem:[#allocation7 + $0x88] sm:$0xff]  }
  0x56   :  { %497 = vmatpush2.bf16.msra.mxu0 %v1432_v34  ;;  %538 = vmatpush2.bf16.msra.mxu1 %v1433_v35  ;;  %v1506_v34 = vld [vmem:[#allocation7] sm:$0xff]  }
  0x57   :  { %498 = vmatprep.subr.bf16.mxu0 %v1434_v36  ;;  %539 = vmatprep.subr.bf16.mxu1 %v1436_v37  ;;  %v1507_v35 = vld [vmem:[#allocation7 + $0x80] sm:$0xff]   ;;  %v1640_v36 = vmov 0.0   ;;  %v140_v37 = vlaneseq }
  0x5a   :  { %499 = vmatpush2.bf16.msra.mxu0 %v1438_v38  ;;  %540 = vmatpush2.bf16.msra.mxu1 %v1439_v39  ;;  %v141_v38 = vshrl.u32 %v140_v37, 7 }
  0x5b   :  { %500 = vmatprep.subr.bf16.mxu0 %v1440_v40  ;;  %541 = vmatprep.subr.bf16.mxu1 %v1442_v41  ;;  %v138_v41 = vld [vmem:[#allocation8] ss:$4 sm:$0xf] }
  0x5c   :  { %v142_v39 = vsub.s32 0, %v141_v38  ;;  %v150_v40 = vsub.s32 2, %v141_v38 }
  0x5e   :  { %501 = vmatpush2.bf16.msra.mxu0 %v1444_v42  ;;  %542 = vmatpush2.bf16.msra.mxu1 %v1445_v43  ;;  %v146_v42 = vsub.s32 1, %v141_v38  ;;  %v154_v43 = vsub.s32 3, %v141_v38 }
  0x5f   :  { %502 = vmatprep.subr.bf16.mxu0 %v1446_v44  ;;  %543 = vmatprep.subr.bf16.mxu1 %v1448_v45  ;;  %v143_v44 = vrot.slane %v138_v41, %v142_v39  ;;  %v151_v45 = vrot.slane %v138_v41, %v150_v40 }
  0x60   :  { %v155_v47 = vrot.slane %v138_v41, %v154_v43 }
  0x62   :  { %503 = vmatpush2.bf16.msra.mxu0 %v1450_v46  ;;  %544 = vmatpush2.bf16.msra.mxu1 %v1451_v48  ;;  %v147_v46 = vrot.slane %v138_v41, %v146_v42 }
  0x63   :  { %504 = vmatprep.subr.bf16.mxu0 %v1452_v50  ;;  %545 = vmatprep.subr.bf16.mxu1 %v1454_v51 }
  0x66   :  { %505 = vmatpush2.bf16.msra.mxu0 %v1456_v52  ;;  %546 = vmatpush2.bf16.msra.mxu1 %v1457_v53 }
  0x67   :  { %506 = vmatprep.subr.bf16.mxu0 %v1458_v54  ;;  %547 = vmatprep.subr.bf16.mxu1 %v1460_v55 }
  0x6a   :  { %507 = vmatpush2.bf16.msra.mxu0 %v1462_v56  ;;  %548 = vmatpush2.bf16.msra.mxu1 %v1463_v57 }
  0x6b   :  { %508 = vmatprep.subr.bf16.mxu0 %v1464_v58  ;;  %549 = vmatprep.subr.bf16.mxu1 %v1466_v59 }
  0x6e   :  { %509 = vmatpush2.bf16.msra.mxu0 %v1468_v60  ;;  %550 = vmatpush2.bf16.msra.mxu1 %v1469_v61 }
  0x6f   :  { %510 = vmatprep.subr.bf16.mxu0 %v1470_v62  ;;  %551 = vmatprep.subr.bf16.mxu1 %v1472_v63 }
  0x72   :  { %511 = vmatpush2.bf16.msra.mxu0 %v1474_v0  ;;  %552 = vmatpush2.bf16.msra.mxu1 %v1475_v1 }
  0x73   :  { %1267 = vmatprep.subr.bf16.mxu0 %v1476_v3  ;;  %1289 = vmatprep.subr.bf16.mxu1 %v1477_v4  ;;  %v1508_v3 = vld [vmem:[#allocation7 + $0x138] sm:$0xff]  }
  0x75   :  { %513 = vmatmul.mubr.bf16.vlgmr.msra.gmra.mxu0 %v72_v6  ;;  %554 = vmatmul.mubr.bf16.vlgmr.msra.gmra.mxu1 %v72_v6  ;;  %v1510_v6 = vld [vmem:[#allocation7 + $0x128] sm:$0xff]  }
  0x76   :  { %1268 = vmatpush3.bf16.msra.mxu0 %v1478_v5  ;;  %1290 = vmatpush3.bf16.msra.mxu1 %v1479_v7  ;;  %v1509_v5 = vld [vmem:[#allocation7 + $0x130] sm:$0xff]   ;;  %v1511_v7 = vld [vmem:[#allocation7 + $0x120] sm:$0xff]  }
  0x77   :  { %1269 = vmatprep.subr.bf16.mxu0 %v1480_v8  ;;  %1291 = vmatprep.subr.bf16.mxu1 %v1481_v9  ;;  %v1512_v8 = vld [vmem:[#allocation7 + $0x118] sm:$0xff]   ;;  %v1513_v9 = vld [vmem:[#allocation7 + $0x110] sm:$0xff]  }
  0x7a   :  { %1270 = vmatpush3.bf16.msra.mxu0 %v1482_v10  ;;  %1292 = vmatpush3.bf16.msra.mxu1 %v1483_v11  ;;  %v1514_v10 = vld [vmem:[#allocation7 + $0x108] sm:$0xff]   ;;  %v1515_v11 = vld [vmem:[#allocation7 + $0x100] sm:$0xff]  }
  0x7b   :  { %1271 = vmatprep.subr.bf16.mxu0 %v1484_v12  ;;  %1293 = vmatprep.subr.bf16.mxu1 %v1485_v13  ;;  %v1516_v12 = vld [vmem:[#allocation7 + $0x178] sm:$0xff]   ;;  %v1517_v13 = vld [vmem:[#allocation7 + $0x170] sm:$0xff]  }
  0x7e   :  { %1272 = vmatpush3.bf16.msra.mxu0 %v1486_v14  ;;  %1294 = vmatpush3.bf16.msra.mxu1 %v1487_v15  ;;  %v1518_v14 = vld [vmem:[#allocation7 + $0x168] sm:$0xff]   ;;  %v1519_v15 = vld [vmem:[#allocation7 + $0x160] sm:$0xff]  }
  0x7f   :  { %1273 = vmatprep.subr.bf16.mxu0 %v1488_v16  ;;  %1295 = vmatprep.subr.bf16.mxu1 %v1489_v17  ;;  %v1520_v16 = vld [vmem:[#allocation7 + $0x158] sm:$0xff]   ;;  %v1521_v17 = vld [vmem:[#allocation7 + $0x150] sm:$0xff]  }
  0x82   :  { %1274 = vmatpush3.bf16.msra.mxu0 %v1490_v18  ;;  %1296 = vmatpush3.bf16.msra.mxu1 %v1491_v19 }
  0x83   :  { %1275 = vmatprep.subr.bf16.mxu0 %v1492_v20  ;;  %1297 = vmatprep.subr.bf16.mxu1 %v1493_v21  ;;  %v1216_v20 = vld [vmem:[#allocation8 + $0x1] ss:$0 sm:$0xff] }
  0x86   :  { %1276 = vmatpush3.bf16.msra.mxu0 %v1494_v22  ;;  %1298 = vmatpush3.bf16.msra.mxu1 %v1495_v23 }
  0x87   :  { %1277 = vmatprep.subr.bf16.mxu0 %v1496_v24  ;;  %1299 = vmatprep.subr.bf16.mxu1 %v1497_v25 }
  0x8a   :  { %1278 = vmatpush3.bf16.msra.mxu0 %v1498_v26  ;;  %1300 = vmatpush3.bf16.msra.mxu1 %v1499_v27 }
  0x8b   :  { %1279 = vmatprep.subr.bf16.mxu0 %v1500_v28  ;;  %1301 = vmatprep.subr.bf16.mxu1 %v1501_v29 }
  0x8e   :  { %1280 = vmatpush3.bf16.msra.mxu0 %v1502_v30  ;;  %1302 = vmatpush3.bf16.msra.mxu1 %v1503_v31 }
  0x8f   :  { %1281 = vmatprep.subr.bf16.mxu0 %v1504_v32  ;;  %1303 = vmatprep.subr.bf16.mxu1 %v1505_v33  ;;  %v1522_v33 = vld [vmem:[#allocation7 + $0x148] sm:$0xff]  }
  0x92   :  { %1282 = vmatpush3.bf16.msra.mxu0 %v1506_v34  ;;  %1304 = vmatpush3.bf16.msra.mxu1 %v1507_v35  ;;  %v1523_v34 = vld [vmem:[#allocation7 + $0x140] sm:$0xff]  }
  0x93   :  { %1329 = vmatprep.subr.bf16.mxu0 %v1640_v36  ;;  %1349 = vmatprep.subr.bf16.mxu1 %v1640_v36  ;;  %v1249_v35 = vld [vmem:[#allocation8 + $0x2] ss:$0 sm:$0xff] }
 0x135   :  { %v514_v48 = vpop.f32.mrf.mxu0  ;;  %v555_v49 = vpop.f32.mrf.mxu1 }
 0x136   :  { %v515_v50 = vadd.f32 %v514_v48, %v143_v44  ;;  %v556_v51 = vadd.f32 %v555_v49, %v151_v45  ;;  %v1258_v44 = vld [vmem:[#allocation8 + $0x3] ss:$0 sm:$0xff] }
 0x137   :  { %v516_v52 = vpop.f32.mrf.mxu0  ;;  %v557_v53 = vpop.f32.mrf.mxu1 }
 0x138   :  { %v564_v54 = vmax.f32 %v556_v51, 0.0  ;;  %v517_v55 = vadd.f32 %v516_v52, %v147_v46  ;;  %v558_v56 = vadd.f32 %v557_v53, %v155_v47  ;;  %v562_v57 = vmax.f32 %v515_v50, 0.0 }
 0x139   :  { %v518_v58 = vpop.f32.mrf.mxu0  ;;  %v559_v59 = vpop.f32.mrf.mxu1 }
 0x13a   :  { %v563_v60 = vmax.f32 %v517_v55, 0.0  ;;  %v565_v61 = vmax.f32 %v558_v56, 0.0  ;;  %v633_v62 = vpack.c.bf16 %v564_v54, %v564_v54  ;;  %v631_v4 = vpack.c.bf16 %v562_v57, %v562_v57 }
 0x13b   :  { %v519_v63 = vpop.f32.mrf.mxu0  ;;  %v560_v0 = vpop.f32.mrf.mxu1 }
 0x13c   :  { %v632_v1 = vpack.c.bf16 %v563_v60, %v563_v60  ;;  %v634_v2 = vpack.c.bf16 %v565_v61, %v565_v61 }
 0x13e   :  { %863 = vmatprep.mubr.bf16.mxu0 %v632_v1  ;;  %903 = vmatprep.mubr.bf16.mxu1 %v634_v2 }
 0x13f   :  { %864 = vmatmul.mubr.bf16.vlgmr.msra.gmra.mxu0 %v631_v4  ;;  %904 = vmatmul.mubr.bf16.vlgmr.msra.gmra.mxu1 %v633_v62 }
 0x140   :  { %1330 = vmatpush3.bf16.msra.mxu0 %v1508_v3  ;;  %1345 = vmatprep.mubr.msk.bf16.mxu0 %vm1641_vm0, %v1640_v36 }
 0x141   :  { %1331 = vmatprep.subr.bf16.mxu0 %v1640_v36  ;;  %1365 = vmatprep.mubr.msk.bf16.mxu1 %vm1641_vm0, %v1640_v36 }
 0x142   :  { %1350 = vmatpush3.bf16.msra.mxu1 %v1516_v12 }
 0x143   :  { %1351 = vmatprep.subr.bf16.mxu1 %v1640_v36 }
 0x144   :  { %1332 = vmatpush3.bf16.msra.mxu0 %v1509_v5 }
 0x145   :  { %1333 = vmatprep.subr.bf16.mxu0 %v1640_v36 }
 0x146   :  { %1352 = vmatpush3.bf16.msra.mxu1 %v1517_v13 }
 0x147   :  { %1353 = vmatprep.subr.bf16.mxu1 %v1640_v36 }
 0x148   :  { %1334 = vmatpush3.bf16.msra.mxu0 %v1510_v6 }
 0x149   :  { %1335 = vmatprep.subr.bf16.mxu0 %v1640_v36 }
 0x14a   :  { %1354 = vmatpush3.bf16.msra.mxu1 %v1518_v14 }
 0x14b   :  { %1355 = vmatprep.subr.bf16.mxu1 %v1640_v36 }
 0x14c   :  { %1336 = vmatpush3.bf16.msra.mxu0 %v1511_v7 }
 0x14d   :  { %1337 = vmatprep.subr.bf16.mxu0 %v1640_v36 }
 0x14e   :  { %1356 = vmatpush3.bf16.msra.mxu1 %v1519_v15 }
 0x14f   :  { %1357 = vmatprep.subr.bf16.mxu1 %v1640_v36 }
 0x150   :  { %1338 = vmatpush3.bf16.msra.mxu0 %v1512_v8 }
 0x151   :  { %1339 = vmatprep.subr.bf16.mxu0 %v1640_v36 }
 0x152   :  { %1358 = vmatpush3.bf16.msra.mxu1 %v1520_v16 }
 0x153   :  { %1359 = vmatprep.subr.bf16.mxu1 %v1640_v36 }
 0x154   :  { %1340 = vmatpush3.bf16.msra.mxu0 %v1513_v9 }
 0x155   :  { %1341 = vmatprep.subr.bf16.mxu0 %v1640_v36 }
 0x156   :  { %1360 = vmatpush3.bf16.msra.mxu1 %v1521_v17 }
 0x157   :  { %1361 = vmatprep.subr.bf16.mxu1 %v1640_v36 }
 0x158   :  { %1342 = vmatpush3.bf16.msra.mxu0 %v1514_v10 }
 0x159   :  { %1343 = vmatprep.subr.bf16.mxu0 %v1640_v36 }
 0x15a   :  { %1362 = vmatpush3.bf16.msra.mxu1 %v1522_v33 }
 0x15b   :  { %1363 = vmatprep.subr.bf16.mxu1 %v1640_v36 }
 0x15c   :  { %1344 = vmatpush3.bf16.msra.mxu0 %v1515_v11 }
 0x15e   :  { %1364 = vmatpush3.bf16.msra.mxu1 %v1523_v34 }
 0x1ff   :  { %v1283_v18 = vpop.f32.mrf.mxu0  ;;  %v1305_v19 = vpop.f32.mrf.mxu1 }
 0x201   :  { %v1284_v21 = vpop.f32.mrf.mxu0  ;;  %v1306_v22 = vpop.f32.mrf.mxu1 }
 0x202   :  { %v1285_v23 = vadd.f32 %v1284_v21, %v1283_v18  ;;  %v1307_v27 = vadd.f32 %v1306_v22, %v1305_v19 }
 0x203   :  { %v1286_v24 = vpop.f32.mrf.mxu0  ;;  %v1308_v25 = vpop.f32.mrf.mxu1 }
 0x204   :  { %v866_v26 = vadd.f32 %v1285_v23, %v1216_v20 }
 0x205   :  { %v1287_v28 = vpop.f32.mrf.mxu0  ;;  %v1309_v29 = vpop.f32.mrf.mxu1 }
 0x206   :  { %v906_v30 = vadd.f32 %v1307_v27, %v866_v26 }
 0x208   :  { %v911_v31 = vmax.f32 %v906_v30, 0.0 }
 0x20a   :  { %v929_v32 = vpack.c.bf16 %v911_v31, %v911_v31 }
 0x20c   :  { %1346 = vmatmul.mubr.bf16.vlgmr.msra.gmra.mxu0 %v929_v32 }
 0x2cc   :  { %v1016_v37 = vpop.f32.mrf.mxu0 }
 0x2cd   :  { %v1017_v38 = vadd.f32 %v1249_v35, %v1016_v37 }
 0x2ce   :  { %v1347_v39 = vpop.f32.mrf.mxu0 }
 0x2cf   :  { %v1022_v40 = vmax.f32 %v1017_v38, 0.0 }
 0x2d0   :  { %v1019_v41 = vpop.f32.mrf.mxu0 }
 0x2d1   :  { %v1040_v42 = vpack.c.bf16 %v1022_v40, %v1022_v40 }
 0x2d2   :  { %v1348_v43 = vpop.f32.mrf.mxu0 }
 0x2d3   :  { %1366 = vmatmul.mubr.bf16.vlgmr.msra.gmra.mxu1 %v1040_v42 }
 0x393   :  { %v1127_v45 = vpop.f32.mrf.mxu1 }
 0x394   :  { %v1128_v46 = vadd.f32 %v1258_v44, %v1127_v45 }
 0x395   :  { %v1367_v47 = vpop.f32.mrf.mxu1 }
 0x396   :  { %v1133_v48 = vmax.f32 %v1128_v46, 0.0 }
 0x397   :  { %v1130_v36 = vpop.f32.mrf.mxu1 }
 0x398   :  { %1134 = vst [vmem:[#allocation10] sm:$0xff] %v1133_v48 }
 0x399   :  { %v1368_v49 = vpop.f32.mrf.mxu1 }
 0x39a   :  { %1615 = shalt.err (!%p1612_p10)
}
 0x39b   :  { %1144 = dma.vmem_to_hbm [thread:$0]  %s1142_s3, 128, %s1705_s4, [#allocation4]  }
 0x39c   :  { %1630 = dma.done.wait [#allocation4], 128  }
 0x39d   :  { %1631 = vsyncadd [#allocation4], 4294967168 }
 0x39e   :  { %1148 = vsyncpa [#allocation3], 1 }
 0x39f   :  { %1149 = vsyncpa [#allocation6], 1 }
 0x3a0   :  { %1150 = vsyncpa [#allocation9], 1 }
 0x3a1   :  { %1151 = vsyncpa [#allocation4], 1 }

</bundles_post_ra>
